<compile_context>
chip_gen: v6e
topology: v6e:2x2x1
jax: 0.10.0
libtpu: 0.0.40
codegen_flags: <defaults>
</compile_context>

<pallas_src>
import functools

import jax
import jax.numpy as jnp
from jax.experimental import pallas as pl
from jax.experimental.pallas import tpu as pltpu


def _round_up(x, m):
    return ((x + m - 1) // m) * m


def _cdiv(a, b):
    return (a + b - 1) // b


def _tpu_config():
    """Returns (bf16_vpu_ok, vmem_capacity_bytes, tensorcores_per_chip), with safe fallbacks."""
    kind = ""
    try:
        kind = (jax.devices()[0].device_kind or "").lower()
    except Exception:
        pass

    vmem_cap = None
    try:
        vmem_cap = int(pltpu.get_tpu_info().vmem_capacity_bytes)
    except Exception:
        vmem_cap = None

    is_v7 = ("v7" in kind) or ("7x" in kind) or ("tpu7" in kind.replace(" ", ""))
    is_pre_v6 = any(t in kind for t in ("v2", "v3", "v4", "v5"))

    if vmem_cap is None:
        # v7x: 64 MiB per TC; v5e/v6e: 128 MiB; unknown: assume the smaller.
        vmem_cap = (128 << 20) if (kind and not is_v7) else (64 << 20)

    bf16_vpu_ok = not is_pre_v6        # v5e/v5p/v4 have no bf16 VALU path -> keep f32 there
    num_tc = 2 if is_v7 else 1
    return bf16_vpu_ok, vmem_cap, num_tc


def _transition_kernel(x_ref, scale_ref, shift_ref, w_ref, o_ref, *, compute_dtype):
    # x_ref:     (4, TM, Cin_pad)    bf16          -- 4 elements of each 2x2 pooling window
    # scale_ref: (1, Cin_pad)        compute_dtype -- gamma / sqrt(var + eps)
    # shift_ref: (1, Cin_pad)        compute_dtype -- beta - mean * scale
    # w_ref:     (Cin_pad, Cout_pad) bf16          -- 1x1 conv weight, 1/4 pool factor folded in
    # o_ref:     (TM, Cout_pad)      bf16
    scale = scale_ref[...]          # hoisted: loaded/broadcast once per grid step
    shift = shift_ref[...]

    def bn_relu(e):
        x = x_ref[e]
        if x.dtype != compute_dtype:
            x = x.astype(compute_dtype)   # f32 VPU path (v5e); bf16 path has no cast
        return jnp.maximum(x * scale + shift, 0.0)

    # 2x2 average pool as 3 elementwise adds (the 1/4 factor lives in W)
    p = (bn_relu(0) + bn_relu(1)) + (bn_relu(2) + bn_relu(3))

    # 1x1 conv on the MXU: bf16 inputs, f32 accumulation, bf16 store
    acc = jnp.dot(p.astype(jnp.bfloat16), w_ref[...],
                  preferred_element_type=jnp.float32)
    o_ref[...] = acc.astype(o_ref.dtype)


def transition_forward(x_nchw, gamma, beta, running_mean, running_var, conv_w, eps=1e-5):
    """x_nchw: (N, Cin, H, W); conv_w: (Cout, Cin, 1, 1). Returns (N, Cout, H//2, W//2)."""
    N, Cin, H, W = x_nchw.shape
    Cout = conv_w.shape[0]
    assert H % 2 == 0 and W % 2 == 0
    Ho, Wo = H // 2, W // 2
    M = N * Ho * Wo
    out_dtype = x_nchw.dtype

    bf16_vpu, vmem_cap, num_tc = _tpu_config()
    compute_dtype = jnp.bfloat16 if bf16_vpu else jnp.float32

    # Lane-dense channel dims (loads, stores, MXU K/N).
    Cin_pad = _round_up(Cin, 128)
    Cout_pad = _round_up(Cout, 128)
    M8 = _round_up(M, 8)                    # only used if M % 8 != 0 (tiny fused pad)

    # ---- fold BN (eval mode, running stats) in f32; fold 1/4 pooling factor into W ----
    f32 = jnp.float32
    scale = gamma.astype(f32) / jnp.sqrt(running_var.astype(f32) + eps)     # (Cin,)
    shift = beta.astype(f32) - running_mean.astype(f32) * scale             # (Cin,)
    scale2 = jnp.zeros((1, Cin_pad), compute_dtype).at[0, :Cin].set(scale.astype(compute_dtype))
    shift2 = jnp.zeros((1, Cin_pad), compute_dtype).at[0, :Cin].set(shift.astype(compute_dtype))
    w_mat = conv_w[:, :, 0, 0].T.astype(f32) * 0.25                          # (Cin, Cout)
    w_pad = jnp.zeros((Cin_pad, Cout_pad), jnp.bfloat16).at[:Cin, :Cout].set(
        w_mat.astype(jnp.bfloat16))

    # ---- single fused rearrangement: NCHW -> (4, M, Cin); axis 0 = 2x2 window element ----
    # TODO(synk): add an NHWC fast path (free window reshape + 4 strided BlockSpec inputs,
    # NHWC output) so both wrapper transposes can be skipped when the surrounding model is NHWC.
    xw = jnp.transpose(x_nchw.reshape(N, Cin, Ho, 2, Wo, 2), (3, 5, 0, 2, 4, 1))
    xw = xw.reshape(4, M, Cin)
    if xw.dtype != jnp.bfloat16:
        xw = xw.astype(jnp.bfloat16)        # bf16 in HBM halves read traffic; no-op if already bf16
    if (M8, Cin_pad) != (M, Cin):
        # Only when Cin % 128 != 0 or M % 8 != 0; fuses with the transpose above.
        # The M tail relative to TM is handled by the grid's partial-block masking (no pad).
        xw = jnp.pad(xw, ((0, 0), (0, M8 - M), (0, Cin_pad - Cin)))

    # ---- generation-aware VMEM budget & tile sizing ----
    vmem_limit = max(min(vmem_cap - (16 << 20), 100 << 20), 32 << 20)
    budget = (vmem_limit * 3) // 4          # leave margin for pipeline bookkeeping

    def footprint(tm):
        return (2 * 4 * tm * Cin_pad * 2    # bf16 input block, double-buffered
                + 2 * tm * Cout_pad * 2     # bf16 output block, double-buffered
                + Cin_pad * Cout_pad * 2    # weight: constant index_map -> resident, single buffer
                + 2 * Cin_pad * 4)          # scale + shift

    TM = 2048 if vmem_cap <= (64 << 20) else 4096
    while TM > 64 and footprint(TM) > budget:
        TM //= 2
    TM = max(8, min(TM, M8))
    # On 2-TC chips make sure there are >= 2 grid steps so both TensorCores get work.
    if num_tc >= 2 and _cdiv(M8, TM) < 2 and M8 >= 16:
        TM = _round_up(_cdiv(M8, 2), 8)

    grid = (_cdiv(M8, TM),)

    kernel = functools.partial(_transition_kernel, compute_dtype=compute_dtype)
    out_flat = pl.pallas_call(
        kernel,
        out_shape=jax.ShapeDtypeStruct((M8, Cout_pad), jnp.bfloat16),
        grid_spec=pltpu.PrefetchScalarGridSpec(
            num_scalar_prefetch=0,
            grid=grid,
            in_specs=[
                pl.BlockSpec((4, TM, Cin_pad), lambda i: (0, i, 0)),
                pl.BlockSpec((1, Cin_pad), lambda i: (0, 0)),
                pl.BlockSpec((1, Cin_pad), lambda i: (0, 0)),
                pl.BlockSpec((Cin_pad, Cout_pad), lambda i: (0, 0)),
            ],
            out_specs=pl.BlockSpec((TM, Cout_pad), lambda i: (i, 0)),
        ),
        compiler_params=pltpu.CompilerParams(
            dimension_semantics=("parallel",),      # lets v7x split the grid across 2 TCs
            vmem_limit_bytes=int(vmem_limit),
        ),
    )(xw, scale2, shift2, w_pad)

    # ---- glue: drop padding, back to NCHW (convert fuses with the transpose) ----
    out = out_flat[:M, :Cout].reshape(N, Ho, Wo, Cout)
    return jnp.transpose(out, (0, 3, 1, 2)).astype(out_dtype)   # (N, Cout, Ho, Wo)


def _reference(x, gamma, beta, mean, var, conv_w, eps=1e-5):
    # pure-JAX f32 reference of the PyTorch forward (eval-mode BN)
    xn = (x - mean[None, :, None, None]) / jnp.sqrt(var[None, :, None, None] + eps)
    xn = xn * gamma[None, :, None, None] + beta[None, :, None, None]
    xn = jnp.maximum(xn, 0.0)
    y = jnp.einsum('nchw,oc->nohw', xn, conv_w[:, :, 0, 0])
    N, Co, H, W = y.shape
    y = y.reshape(N, Co, H // 2, 2, W // 2, 2).mean(axis=(3, 5))
    return y


if __name__ == "__main__":
    key = jax.random.PRNGKey(0)
    N, Cin, Cout, H, W = 2, 4, 8, 16, 16

    k = jax.random.split(key, 6)
    x = jax.random.normal(k[0], (N, Cin, H, W), dtype=jnp.float32)
    gamma = jax.random.normal(k[1], (Cin,), dtype=jnp.float32) * 0.1 + 1.0
    beta = jax.random.normal(k[2], (Cin,), dtype=jnp.float32) * 0.1
    running_mean = jax.random.normal(k[3], (Cin,), dtype=jnp.float32) * 0.1
    running_var = jnp.abs(jax.random.normal(k[4], (Cin,), dtype=jnp.float32)) * 0.5 + 0.5
    conv_w = jax.random.normal(k[5], (Cout, Cin, 1, 1), dtype=jnp.float32) * (1.0 / jnp.sqrt(Cin))

    out = transition_forward(x, gamma, beta, running_mean, running_var, conv_w)
    out = jax.block_until_ready(out)

    ref = _reference(x, gamma, beta, running_mean, running_var, conv_w)
    assert out.shape == (N, Cout, H // 2, W // 2), out.shape
    # bf16 activations/weights (and bf16 VPU math on v6e/v7x) => compare at bf16 tolerance
    assert jnp.allclose(out, ref, atol=5e-2, rtol=5e-2), float(jnp.max(jnp.abs(out - ref)))

    print("KERNEL_OK")
</pallas_src>

<mosaic_0001>
module attributes {stable_mosaic.version = 11 : i64} {
  func.func @_transition_kernel(%arg0: i32, %arg1: memref<4x128x128xbf16, #tpu.memory_space<vmem>>, %arg2: memref<1x128xbf16, #tpu.memory_space<vmem>>, %arg3: memref<1x128xbf16, #tpu.memory_space<vmem>>, %arg4: memref<128x128xbf16, #tpu.memory_space<vmem>>, %arg5: memref<128x128xbf16, #tpu.memory_space<vmem>>) attributes {dimension_semantics = [#tpu.dimension_semantics<parallel>], iteration_bounds = array<i64: 1>, scalar_prefetch = 0 : i64, scratch_operands = 0 : i64, tpu.core_type = #tpu.core_type<tc>, window_params = [{transform_indices = @transform_0, window_bounds = array<i64: 4, 128, 128>}, {pipeline_mode = #tpu.pipeline_mode<synchronous>, transform_indices = @transform_1, window_bounds = array<i64: 1, 128>}, {pipeline_mode = #tpu.pipeline_mode<synchronous>, transform_indices = @transform_2, window_bounds = array<i64: 1, 128>}, {pipeline_mode = #tpu.pipeline_mode<synchronous>, transform_indices = @transform_3, window_bounds = array<i64: 128, 128>}, {transform_indices = @transform_4, window_bounds = array<i64: 128, 128>}]} {
    %c0 = arith.constant 0 : index
    %c0_0 = arith.constant 0 : index
    %0 = vector.load %arg2[%c0, %c0_0] : memref<1x128xbf16, #tpu.memory_space<vmem>>, vector<1x128xbf16>
    %c0_1 = arith.constant 0 : index
    %c0_2 = arith.constant 0 : index
    %1 = vector.load %arg3[%c0_1, %c0_2] : memref<1x128xbf16, #tpu.memory_space<vmem>>, vector<1x128xbf16>
    %c0_3 = arith.constant 0 : index
    %c0_4 = arith.constant 0 : index
    %c0_5 = arith.constant 0 : index
    %2 = vector.load %arg1[%c0_3, %c0_4, %c0_5] : memref<4x128x128xbf16, #tpu.memory_space<vmem>>, vector<1x128x128xbf16>
    %3 = vector.shape_cast %2 : vector<1x128x128xbf16> to vector<128x128xbf16>
    %4 = vector.broadcast %0 : vector<1x128xbf16> to vector<128x128xbf16>
    %5 = arith.mulf %3, %4 : vector<128x128xbf16>
    %6 = vector.broadcast %1 : vector<1x128xbf16> to vector<128x128xbf16>
    %7 = arith.addf %5, %6 : vector<128x128xbf16>
    %cst = arith.constant 0.000000e+00 : bf16
    %8 = vector.broadcast %cst : bf16 to vector<128x128xbf16>
    %9 = arith.maximumf %7, %8 : vector<128x128xbf16>
    %c1 = arith.constant 1 : index
    %c0_6 = arith.constant 0 : index
    %c0_7 = arith.constant 0 : index
    %10 = vector.load %arg1[%c1, %c0_6, %c0_7] : memref<4x128x128xbf16, #tpu.memory_space<vmem>>, vector<1x128x128xbf16>
    %11 = vector.shape_cast %10 : vector<1x128x128xbf16> to vector<128x128xbf16>
    %12 = vector.broadcast %0 : vector<1x128xbf16> to vector<128x128xbf16>
    %13 = arith.mulf %11, %12 : vector<128x128xbf16>
    %14 = vector.broadcast %1 : vector<1x128xbf16> to vector<128x128xbf16>
    %15 = arith.addf %13, %14 : vector<128x128xbf16>
    %cst_8 = arith.constant 0.000000e+00 : bf16
    %16 = vector.broadcast %cst_8 : bf16 to vector<128x128xbf16>
    %17 = arith.maximumf %15, %16 : vector<128x128xbf16>
    %18 = arith.addf %9, %17 : vector<128x128xbf16>
    %c2 = arith.constant 2 : index
    %c0_9 = arith.constant 0 : index
    %c0_10 = arith.constant 0 : index
    %19 = vector.load %arg1[%c2, %c0_9, %c0_10] : memref<4x128x128xbf16, #tpu.memory_space<vmem>>, vector<1x128x128xbf16>
    %20 = vector.shape_cast %19 : vector<1x128x128xbf16> to vector<128x128xbf16>
    %21 = vector.broadcast %0 : vector<1x128xbf16> to vector<128x128xbf16>
    %22 = arith.mulf %20, %21 : vector<128x128xbf16>
    %23 = vector.broadcast %1 : vector<1x128xbf16> to vector<128x128xbf16>
    %24 = arith.addf %22, %23 : vector<128x128xbf16>
    %cst_11 = arith.constant 0.000000e+00 : bf16
    %25 = vector.broadcast %cst_11 : bf16 to vector<128x128xbf16>
    %26 = arith.maximumf %24, %25 : vector<128x128xbf16>
    %c3 = arith.constant 3 : index
    %c0_12 = arith.constant 0 : index
    %c0_13 = arith.constant 0 : index
    %27 = vector.load %arg1[%c3, %c0_12, %c0_13] : memref<4x128x128xbf16, #tpu.memory_space<vmem>>, vector<1x128x128xbf16>
    %28 = vector.shape_cast %27 : vector<1x128x128xbf16> to vector<128x128xbf16>
    %29 = vector.broadcast %0 : vector<1x128xbf16> to vector<128x128xbf16>
    %30 = arith.mulf %28, %29 : vector<128x128xbf16>
    %31 = vector.broadcast %1 : vector<1x128xbf16> to vector<128x128xbf16>
    %32 = arith.addf %30, %31 : vector<128x128xbf16>
    %cst_14 = arith.constant 0.000000e+00 : bf16
    %33 = vector.broadcast %cst_14 : bf16 to vector<128x128xbf16>
    %34 = arith.maximumf %32, %33 : vector<128x128xbf16>
    %35 = arith.addf %26, %34 : vector<128x128xbf16>
    %36 = arith.addf %18, %35 : vector<128x128xbf16>
    %c0_15 = arith.constant 0 : index
    %c0_16 = arith.constant 0 : index
    %37 = vector.load %arg4[%c0_15, %c0_16] : memref<128x128xbf16, #tpu.memory_space<vmem>>, vector<128x128xbf16>
    %cst_17 = arith.constant dense<0.000000e+00> : vector<128x128xf32>
    %38 = tpu.matmul %36, %37, %cst_17 {dimension_numbers = #tpu.dot_dimension_numbers<[1], [0], [0], [1], [0, 0, 1, 1], [], []>} : vector<128x128xbf16>, vector<128x128xbf16>, vector<128x128xf32> -> vector<128x128xf32>
    %39 = arith.truncf %38 : vector<128x128xf32> to vector<128x128xbf16>
    %c0_18 = arith.constant 0 : index
    %c0_19 = arith.constant 0 : index
    %40 = vector.load %arg5[%c0_18, %c0_19] : memref<128x128xbf16, #tpu.memory_space<vmem>>, vector<128x128xbf16>
    tpu.vector_store %arg5[%c0_18, %c0_19], %39 {strides = array<i32>} : memref<128x128xbf16, #tpu.memory_space<vmem>>, vector<128x128xbf16>,
    return
  }
  func.func @transform_0(%arg0: i32) -> (i32, i32, i32) {
    %c0_i32 = arith.constant 0 : i32
    %c0_i32_0 = arith.constant 0 : i32
    %c0_i32_1 = arith.constant 0 : i32
    return %c0_i32, %arg0, %c0_i32_0 : i32, i32, i32
  }
  func.func @transform_1(%arg0: i32) -> (i32, i32) {
    %c0_i32 = arith.constant 0 : i32
    %c0_i32_0 = arith.constant 0 : i32
    %c0_i32_1 = arith.constant 0 : i32
    return %c0_i32, %c0_i32_0 : i32, i32
  }
  func.func @transform_2(%arg0: i32) -> (i32, i32) {
    %c0_i32 = arith.constant 0 : i32
    %c0_i32_0 = arith.constant 0 : i32
    %c0_i32_1 = arith.constant 0 : i32
    return %c0_i32, %c0_i32_0 : i32, i32
  }
  func.func @transform_3(%arg0: i32) -> (i32, i32) {
    %c0_i32 = arith.constant 0 : i32
    %c0_i32_0 = arith.constant 0 : i32
    %c0_i32_1 = arith.constant 0 : i32
    return %c0_i32, %c0_i32_0 : i32, i32
  }
  func.func @transform_4(%arg0: i32) -> (i32, i32) {
    %c0_i32 = arith.constant 0 : i32
    %c0_i32_0 = arith.constant 0 : i32
    return %arg0, %c0_i32 : i32, i32
  }
}

</mosaic_0001>

<bundles_post_ra>
// kernel: tpu_custom_call.1
= control target key start
LH: loop header
LB: loop body
LE: loop exit
PB: predicated region body
PF: predicated region fallthrough
CT: control target
= control target key end

     0   :  { %9 = vsyncpa [#allocation3], 0  ;;  %s1189_s0 = inlined_call_operand.hbm [shape: bf16[4,128,128], index: 0, kind: input, shape index: {}]   ;;  %s1190_s1 = inlined_call_operand.vmem [shape: bf16[1,128], index: 1, kind: input, shape index: {}]   ;;  %s1191_s2 = inlined_call_operand.vmem [shape: bf16[1,128], index: 2, kind: input, shape index: {}]   ;;  %s1192_s3 = inlined_call_operand.hbm [shape: bf16[128,128], index: 3, kind: input, shape index: {}]   ;;  %s1193_s4 = inlined_call_operand.hbm [shape: bf16[128,128], index: 4, kind: output, shape index: {}]  }
   0x1   :  { %10 = vsyncpa [#allocation6], 0 }
   0x2   :  { %11 = vsyncpa [#allocation4], 0  ;;  %s926_s15 = smov [#allocation2]  }
   0x3   :  { %s17_s16 = sshll.u32 %s926_s15, 4  ;;  %s18_s16 = int_to_ptr.vmem [resolvable:$true] %s17_s16 }
   0x4   :  { %s868_s17 = scalar_lea.vmem %s18_s16, 4096  ;;  %p873_p1 = scmp.lt.s32.totalorder %s18_s16, %s18_s16 }
   0x5   :  { %p869_p0 = scmp.ne.s32.totalorder %s18_s16, %s868_s17  ;;  %p874_p2 = scmp.lt.s32.totalorder %s868_s17, %s868_s17 }
   0x7   :  { %p875_p3 = por %p874_p2, %p873_p1 }
   0x9   :  { %p876_p4 = pnand %p875_p3, %p869_p0 }
   0xb   :  { %879 = shalt.err (!%p876_p4)
}
   0xc   :  { %s927_s18 = smov 64   ;;  %s928_s19 = smov 4  }
   0xd   :  { %23 = dma.hbm_to_vmem [thread:$0]  %s1189_s0, 4096, %s18_s16, [#allocation3], %s927_s18, %s927_s18, %s928_s19  }
   0xe   :  { %s929_s22 = smov [#allocation5]  }
   0xf   :  { %s33_s23 = sshll.u32 %s929_s22, 4  ;;  %s34_s23 = int_to_ptr.vmem [resolvable:$true] %s33_s23 }
  0x10   :  { %s888_s24 = scalar_lea.vmem %s34_s23, 1024  ;;  %p893_p6 = scmp.lt.s32.totalorder %s34_s23, %s34_s23 }
  0x11   :  { %p889_p5 = scmp.ne.s32.totalorder %s34_s23, %s888_s24  ;;  %p894_p7 = scmp.lt.s32.totalorder %s888_s24, %s888_s24 }
  0x13   :  { %p895_p8 = por %p894_p7, %p893_p6 }
  0x15   :  { %p896_p9 = pnand %p895_p8, %p889_p5 }
  0x17   :  { %899 = shalt.err (!%p896_p9)
}
  0x18   :  { %39 = dma.hbm_to_vmem [thread:$0]  %s1192_s3, 1024, %s34_s23, [#allocation6], %s927_s18, %s927_s18, %s928_s19  }
  0x19   :  { %920 = dma.done.wait [#allocation3], 4096  }
  0x1a   :  { %921 = vsyncadd [#allocation3], 4294963200 }
  0x1b   :  { %922 = dma.done.wait [#allocation6], 1024  }
  0x1c   :  { %923 = vsyncadd [#allocation6], 4294966272  ;;  %v68_v0 = vlaneseq  ;;  %v852_v1 = vld [vmem:[#allocation5 + $0x38] sm:$0xff]   ;;  %v853_v2 = vld [vmem:[#allocation5 + $0x30] sm:$0xff]   ;;  %v930_v40 = vmov 0  }
  0x1d   :  { %798 = vmatprep.subr.bf16.mxu0 %v852_v1  ;;  %830 = vmatprep.subr.bf16.mxu1 %v852_v1  ;;  %v854_v4 = vld [vmem:[#allocation5 + $0x28] sm:$0xff]   ;;  %v855_v6 = vld [vmem:[#allocation5 + $0x20] sm:$0xff]   ;;  %v856_v11 = vld [vmem:[#allocation5 + $0x18] sm:$0xff]  }
  0x1e   :  { %799 = vmatpush3.bf16.msra.mxu0 %v852_v1  ;;  %838 = vmatpush3.bf16.msra.mxu1 %v852_v1  ;;  %v69_v3 = vshrl.u32 %v68_v0, 7  ;;  %v47_v7 = vld [vmem:[%s1190_s1] sm:$0x1]  ;;  %v50_v15 = vld [vmem:[#allocation2 + $0x4] sm:$0xf]  ;;  %v857_v27 = vld [vmem:[#allocation5 + $0x10] sm:$0xff]  }
  0x1f   :  { %800 = vmatprep.subr.bf16.mxu0 %v853_v2  ;;  %831 = vmatprep.subr.bf16.mxu1 %v853_v2  ;;  %v48_v8 = vld [vmem:[%s1191_s2] sm:$0x1]  ;;  %v66_v9 = vpack.i.b16 %v47_v7, %v47_v7  ;;  %v137_v19 = vld [vmem:[#allocation2 + $0x44] sm:$0xf]  ;;  %v858_v47 = vld [vmem:[#allocation5 + $0x8] sm:$0xff]   ;;  %s931_s1 = smov [#allocation7]  }
  0x20   :  { %v70_v5 = vsub.s32 0, %v69_v3  ;;  %v93_v10 = vpack.i.b16 %v48_v8, %v48_v8  ;;  %v49_v14 = vld [vmem:[#allocation2] sm:$0xf]  ;;  %v218_v21 = vld [vmem:[#allocation2 + $0x84] sm:$0xf]  ;;  %s672_s2 = sshll.u32 %s931_s1, 4  ;;  %s673_s2 = int_to_ptr.vmem [resolvable:$true] %s672_s2 }
  0x21   :  { %v136_v16 = vld [vmem:[#allocation2 + $0x40] sm:$0xf]  ;;  %v283_v26 = vld [vmem:[#allocation2 + $0xc4] sm:$0xf]  ;;  %s900_s29 = scalar_lea.vmem %s673_s2, 1024  ;;  %p905_p11 = scmp.lt.s32.totalorder %s673_s2, %s673_s2 }
  0x22   :  { %801 = vmatpush3.bf16.msra.mxu0 %v853_v2  ;;  %839 = vmatpush3.bf16.msra.mxu1 %v853_v2  ;;  %v71_v12 = vrot.slane %v66_v9, %v70_v5  ;;  %v98_v13 = vrot.slane %v93_v10, %v70_v5  ;;  %v217_v20 = vld [vmem:[#allocation2 + $0x80] sm:$0xf]  ;;  %v58_v44 = vld [vmem:[#allocation2 + $0x24] sm:$0xf]  ;;  %p901_p10 = scmp.ne.s32.totalorder %s673_s2, %s900_s29  ;;  %p906_p12 = scmp.lt.s32.totalorder %s900_s29, %s900_s29 }
  0x23   :  { %802 = vmatprep.subr.bf16.mxu0 %v854_v4  ;;  %832 = vmatprep.subr.bf16.mxu1 %v854_v4  ;;  %v282_v22 = vld [vmem:[#allocation2 + $0xc0] sm:$0xf]  ;;  %v145_v46 = vld [vmem:[#allocation2 + $0x64] sm:$0xf] }
  0x24   :  { %v975_v17 = vcombine.low %v71_v12, %v71_v12  ;;  %v977_v18 = vcombine.low %v98_v13, %v98_v13  ;;  %v57_v39 = vld [vmem:[#allocation2 + $0x20] sm:$0xf]  ;;  %v226_v63 = vld [vmem:[#allocation2 + $0xa4] sm:$0xf]  ;;  %p907_p13 = por %p906_p12, %p905_p11 }
  0x25   :  { %v144_v45 = vld [vmem:[#allocation2 + $0x60] sm:$0xf]  ;;  %v291_v13 = vld [vmem:[#allocation2 + $0xe4] sm:$0xf] }
  0x26   :  { %803 = vmatpush3.bf16.msra.mxu0 %v854_v4  ;;  %840 = vmatpush3.bf16.msra.mxu1 %v854_v4  ;;  %v76_v23 = vmul.bf16 %v975_v17, %v49_v14  ;;  %v77_v24 = vmul.bf16 %v975_v17, %v50_v15  ;;  %v152_v25 = vmul.bf16 %v975_v17, %v136_v16  ;;  %v225_v59 = vld [vmem:[#allocation2 + $0xa0] sm:$0xf]  ;;  %p908_p0 = pnand %p907_p13, %p901_p10 }
  0x27   :  { %804 = vmatprep.subr.bf16.mxu0 %v855_v6  ;;  %833 = vmatprep.subr.bf16.mxu1 %v855_v6  ;;  %v153_v28 = vmul.bf16 %v975_v17, %v137_v19  ;;  %v233_v29 = vmul.bf16 %v975_v17, %v217_v20  ;;  %v234_v30 = vmul.bf16 %v975_v17, %v218_v21  ;;  %v859_v0 = vld [vmem:[#allocation5] sm:$0xff]   ;;  %v51_v19 = vld [vmem:[#allocation2 + $0x8] sm:$0xf]  ;;  %v52_v20 = vld [vmem:[#allocation2 + $0xc] sm:$0xf] }
  0x28   :  { %v103_v31 = vadd.bf16 %v977_v18, %v76_v23  ;;  %v104_v32 = vadd.bf16 %v977_v18, %v77_v24  ;;  %v168_v33 = vadd.bf16 %v977_v18, %v152_v25  ;;  %v298_v34 = vmul.bf16 %v975_v17, %v282_v22  ;;  %v290_v12 = vld [vmem:[#allocation2 + $0xe0] sm:$0xf]  ;;  %v138_v21 = vld [vmem:[#allocation2 + $0x48] sm:$0xf]  ;;  %v139_v25 = vld [vmem:[#allocation2 + $0x4c] sm:$0xf] }
  0x29   :  { %v169_v35 = vadd.bf16 %v977_v18, %v153_v28  ;;  %v249_v36 = vadd.bf16 %v977_v18, %v233_v29  ;;  %v250_v37 = vadd.bf16 %v977_v18, %v234_v30  ;;  %v299_v38 = vmul.bf16 %v975_v17, %v283_v26  ;;  %v219_v30 = vld [vmem:[#allocation2 + $0x88] sm:$0xf] }
  0x2a   :  { %805 = vmatpush3.bf16.msra.mxu0 %v855_v6  ;;  %841 = vmatpush3.bf16.msra.mxu1 %v855_v6  ;;  %v119_v41 = vmax.bf16 %v930_v40, %v103_v31  ;;  %v120_v42 = vmax.bf16 %v930_v40, %v104_v32  ;;  %v184_v43 = vmax.bf16 %v930_v40, %v168_v33 }
  0x2b   :  { %806 = vmatprep.subr.bf16.mxu0 %v856_v11  ;;  %834 = vmatprep.subr.bf16.mxu1 %v856_v11  ;;  %v185_v48 = vmax.bf16 %v930_v40, %v169_v35  ;;  %v265_v49 = vmax.bf16 %v930_v40, %v249_v36  ;;  %v266_v50 = vmax.bf16 %v930_v40, %v250_v37  ;;  %v220_v35 = vld [vmem:[#allocation2 + $0x8c] sm:$0xf] }
  0x2c   :  { %v200_v51 = vadd.bf16 %v184_v43, %v119_v41  ;;  %v314_v52 = vadd.bf16 %v977_v18, %v298_v34  ;;  %v315_v53 = vadd.bf16 %v977_v18, %v299_v38  ;;  %v84_v54 = vmul.bf16 %v975_v17, %v57_v39 }
  0x2d   :  { %v201_v55 = vadd.bf16 %v185_v48, %v120_v42  ;;  %v85_v56 = vmul.bf16 %v975_v17, %v58_v44  ;;  %v160_v57 = vmul.bf16 %v975_v17, %v144_v45  ;;  %v161_v58 = vmul.bf16 %v975_v17, %v145_v46  ;;  %v284_v48 = vld [vmem:[#allocation2 + $0xc8] sm:$0xf] }
  0x2e   :  { %807 = vmatpush3.bf16.msra.mxu0 %v856_v11  ;;  %842 = vmatpush3.bf16.msra.mxu1 %v856_v11  ;;  %v330_v60 = vmax.bf16 %v930_v40, %v314_v52  ;;  %v331_v61 = vmax.bf16 %v930_v40, %v315_v53  ;;  %v111_v62 = vadd.bf16 %v977_v18, %v84_v54 }
  0x2f   :  { %808 = vmatprep.subr.bf16.mxu0 %v857_v27  ;;  %835 = vmatprep.subr.bf16.mxu1 %v857_v27  ;;  %v112_v1 = vadd.bf16 %v977_v18, %v85_v56  ;;  %v176_v2 = vadd.bf16 %v977_v18, %v160_v57  ;;  %v177_v3 = vadd.bf16 %v977_v18, %v161_v58  ;;  %v59_v58 = vld [vmem:[#allocation2 + $0x28] sm:$0xf] }
  0x30   :  { %v346_v4 = vadd.bf16 %v330_v60, %v265_v49  ;;  %v347_v5 = vadd.bf16 %v331_v61, %v266_v50  ;;  %v1012_v6 = vmax.bf16 %v930_v40, %v111_v62  ;;  %v241_v7 = vmul.bf16 %v975_v17, %v225_v59  ;;  %v285_v49 = vld [vmem:[#allocation2 + $0xcc] sm:$0xf] }
  0x31   :  { %v1016_v8 = vmax.bf16 %v930_v40, %v112_v1  ;;  %v1019_v9 = vmax.bf16 %v930_v40, %v176_v2  ;;  %v1022_v10 = vmax.bf16 %v930_v40, %v177_v3  ;;  %v242_v11 = vmul.bf16 %v975_v17, %v226_v63  ;;  %v60_v59 = vld [vmem:[#allocation2 + $0x2c] sm:$0xf]  ;;  %v227_v2 = vld [vmem:[#allocation2 + $0xa8] sm:$0xf] }
  0x32   :  { %809 = vmatpush3.bf16.msra.mxu0 %v857_v27  ;;  %843 = vmatpush3.bf16.msra.mxu1 %v857_v27  ;;  %v362_v14 = vadd.bf16 %v346_v4, %v200_v51  ;;  %v363_v15 = vadd.bf16 %v347_v5, %v201_v55  ;;  %v257_v16 = vadd.bf16 %v977_v18, %v241_v7  ;;  %v147_v1 = vld [vmem:[#allocation2 + $0x6c] sm:$0xf] }
  0x33   :  { %810 = vmatprep.subr.bf16.mxu0 %v858_v47  ;;  %836 = vmatprep.subr.bf16.mxu1 %v858_v47  ;;  %v208_v22 = vadd.bf16 %v1019_v9, %v1012_v6  ;;  %v209_v23 = vadd.bf16 %v1022_v10, %v1016_v8  ;;  %v258_v24 = vadd.bf16 %v977_v18, %v242_v11  ;;  %v228_v11 = vld [vmem:[#allocation2 + $0xac] sm:$0xf] }
  0x34   :  { %v687_v26 = vcombine.low %v362_v14, %v363_v15  ;;  %v273_v27 = vmax.bf16 %v930_v40, %v257_v16  ;;  %v306_v28 = vmul.bf16 %v975_v17, %v290_v12  ;;  %v307_v29 = vmul.bf16 %v975_v17, %v291_v13 }
  0x35   :  { %v274_v31 = vmax.bf16 %v930_v40, %v258_v24  ;;  %v78_v32 = vmul.bf16 %v975_v17, %v51_v19  ;;  %v79_v33 = vmul.bf16 %v975_v17, %v52_v20  ;;  %v154_v34 = vmul.bf16 %v975_v17, %v138_v21 }
  0x36   :  { %811 = vmatpush3.bf16.msra.mxu0 %v858_v47  ;;  %844 = vmatpush3.bf16.msra.mxu1 %v858_v47  ;;  %v322_v36 = vadd.bf16 %v977_v18, %v306_v28  ;;  %v323_v37 = vadd.bf16 %v977_v18, %v307_v29  ;;  %v155_v38 = vmul.bf16 %v975_v17, %v139_v25 }
  0x37   :  { %812 = vmatprep.subr.bf16.mxu0 %v859_v0  ;;  %837 = vmatprep.subr.bf16.mxu1 %v859_v0  ;;  %v105_v39 = vadd.bf16 %v977_v18, %v78_v32  ;;  %v106_v41 = vadd.bf16 %v977_v18, %v79_v33  ;;  %v170_v42 = vadd.bf16 %v977_v18, %v154_v34  ;;  %v53_v32 = vld [vmem:[#allocation2 + $0x10] sm:$0xf] }
  0x38   :  { %814 = vmatprep.mubr.bf16.mxu0 %v687_v26  ;;  %v235_v43 = vmul.bf16 %v975_v17, %v219_v30  ;;  %v338_v44 = vmax.bf16 %v930_v40, %v322_v36  ;;  %v339_v45 = vmax.bf16 %v930_v40, %v323_v37  ;;  %v171_v46 = vadd.bf16 %v977_v18, %v155_v38  ;;  %v292_v26 = vld [vmem:[#allocation2 + $0xe8] sm:$0xf]  ;;  %v54_v37 = vld [vmem:[#allocation2 + $0x14] sm:$0xf] }
  0x39   :  { %v236_v47 = vmul.bf16 %v975_v17, %v220_v35  ;;  %v121_v50 = vmax.bf16 %v930_v40, %v105_v39  ;;  %v122_v51 = vmax.bf16 %v930_v40, %v106_v41  ;;  %v186_v52 = vmax.bf16 %v930_v40, %v170_v42 }
  0x3a   :  { %813 = vmatpush3.bf16.msra.mxu0 %v859_v0  ;;  %845 = vmatpush3.bf16.msra.mxu1 %v859_v0  ;;  %v251_v53 = vadd.bf16 %v977_v18, %v235_v43  ;;  %v354_v54 = vadd.bf16 %v338_v44, %v273_v27  ;;  %v355_v55 = vadd.bf16 %v339_v45, %v274_v31  ;;  %v146_v0 = vld [vmem:[#allocation2 + $0x68] sm:$0xf]  ;;  %v293_v27 = vld [vmem:[#allocation2 + $0xec] sm:$0xf]  ;;  %v140_v43 = vld [vmem:[#allocation2 + $0x50] sm:$0xf] }
  0x3b   :  { %v187_v56 = vmax.bf16 %v930_v40, %v171_v46  ;;  %v252_v57 = vadd.bf16 %v977_v18, %v236_v47  ;;  %v202_v60 = vadd.bf16 %v186_v52, %v121_v50  ;;  %v300_v62 = vmul.bf16 %v975_v17, %v284_v48  ;;  %v141_v44 = vld [vmem:[#allocation2 + $0x54] sm:$0xf]  ;;  %v221_v45 = vld [vmem:[#allocation2 + $0x90] sm:$0xf] }
  0x3c   :  { %v267_v61 = vmax.bf16 %v930_v40, %v251_v53  ;;  %v301_v63 = vmul.bf16 %v975_v17, %v285_v49  ;;  %v370_v3 = vadd.bf16 %v354_v54, %v208_v22  ;;  %v371_v4 = vadd.bf16 %v355_v55, %v209_v23  ;;  %v222_v50 = vld [vmem:[#allocation2 + $0x94] sm:$0xf] }
  0x3d   :  { %v203_v5 = vadd.bf16 %v187_v56, %v122_v51  ;;  %v268_v6 = vmax.bf16 %v930_v40, %v252_v57  ;;  %v316_v7 = vadd.bf16 %v977_v18, %v300_v62  ;;  %v86_v9 = vmul.bf16 %v975_v17, %v59_v58 }
  0x3e   :  { %v317_v8 = vadd.bf16 %v977_v18, %v301_v63  ;;  %v87_v10 = vmul.bf16 %v975_v17, %v60_v59  ;;  %v691_v12 = vcombine.low %v370_v3, %v371_v4  ;;  %v162_v13 = vmul.bf16 %v975_v17, %v146_v0  ;;  %v286_v63 = vld [vmem:[#allocation2 + $0xd0] sm:$0xf]  ;;  %v287_v4 = vld [vmem:[#allocation2 + $0xd4] sm:$0xf] }
  0x3f   :  { %v163_v14 = vmul.bf16 %v975_v17, %v147_v1  ;;  %v243_v15 = vmul.bf16 %v975_v17, %v227_v2  ;;  %v332_v16 = vmax.bf16 %v930_v40, %v316_v7  ;;  %v113_v20 = vadd.bf16 %v977_v18, %v86_v9  ;;  %v61_v9 = vld [vmem:[#allocation2 + $0x30] sm:$0xf] }
  0x40   :  { %v333_v19 = vmax.bf16 %v930_v40, %v317_v8  ;;  %v114_v21 = vadd.bf16 %v977_v18, %v87_v10  ;;  %822 = vmatprep.mubr.bf16.mxu1 %v691_v12  ;;  %v178_v22 = vadd.bf16 %v977_v18, %v162_v13  ;;  %v244_v24 = vmul.bf16 %v975_v17, %v228_v11 }
  0x41   :  { %v179_v23 = vadd.bf16 %v977_v18, %v163_v14  ;;  %v259_v25 = vadd.bf16 %v977_v18, %v243_v15  ;;  %v348_v28 = vadd.bf16 %v332_v16, %v267_v61  ;;  %v129_v30 = vmax.bf16 %v930_v40, %v113_v20  ;;  %v62_v14 = vld [vmem:[#allocation2 + $0x34] sm:$0xf]  ;;  %v148_v15 = vld [vmem:[#allocation2 + $0x70] sm:$0xf] }
  0x42   :  { %v349_v29 = vadd.bf16 %v333_v19, %v268_v6  ;;  %v130_v31 = vmax.bf16 %v930_v40, %v114_v21  ;;  %v194_v33 = vmax.bf16 %v930_v40, %v178_v22  ;;  %v260_v35 = vadd.bf16 %v977_v18, %v244_v24  ;;  %v149_v22 = vld [vmem:[#allocation2 + $0x74] sm:$0xf] }
  0x43   :  { %v195_v34 = vmax.bf16 %v930_v40, %v179_v23  ;;  %v275_v36 = vmax.bf16 %v930_v40, %v259_v25  ;;  %v364_v38 = vadd.bf16 %v348_v28, %v202_v60  ;;  %v308_v41 = vmul.bf16 %v975_v17, %v292_v26  ;;  %v229_v23 = vld [vmem:[#allocation2 + $0xb0] sm:$0xf]  ;;  %v230_v28 = vld [vmem:[#allocation2 + $0xb4] sm:$0xf] }
  0x44   :  { %v365_v39 = vadd.bf16 %v349_v29, %v203_v5  ;;  %v309_v42 = vmul.bf16 %v975_v17, %v293_v27  ;;  %v210_v46 = vadd.bf16 %v194_v33, %v129_v30  ;;  %v276_v48 = vmax.bf16 %v930_v40, %v260_v35 }
  0x45   :  { %v211_v47 = vadd.bf16 %v195_v34, %v130_v31  ;;  %v80_v49 = vmul.bf16 %v975_v17, %v53_v32  ;;  %v324_v52 = vadd.bf16 %v977_v18, %v308_v41  ;;  %v81_v54 = vmul.bf16 %v975_v17, %v54_v37 }
  0x46   :  { %v688_v51 = vcombine.low %v364_v38, %v365_v39  ;;  %v325_v53 = vadd.bf16 %v977_v18, %v309_v42  ;;  %v156_v56 = vmul.bf16 %v975_v17, %v140_v43  ;;  %v157_v57 = vmul.bf16 %v975_v17, %v141_v44  ;;  %v294_v42 = vld [vmem:[#allocation2 + $0xf0] sm:$0xf] }
  0x47   :  { %v107_v55 = vadd.bf16 %v977_v18, %v80_v49  ;;  %v237_v58 = vmul.bf16 %v975_v17, %v221_v45  ;;  %v340_v59 = vmax.bf16 %v930_v40, %v324_v52  ;;  %v108_v61 = vadd.bf16 %v977_v18, %v81_v54  ;;  %v55_v52 = vld [vmem:[#allocation2 + $0x18] sm:$0xf] }
  0x48   :  { %815 = vmatmul.mubr.bf16.vlgmr.msra.gmra.mxu0 %v688_v51  ;;  %v341_v60 = vmax.bf16 %v930_v40, %v325_v53  ;;  %v238_v62 = vmul.bf16 %v975_v17, %v222_v50  ;;  %v172_v1 = vadd.bf16 %v977_v18, %v156_v56  ;;  %v173_v2 = vadd.bf16 %v977_v18, %v157_v57  ;;  %v56_v53 = vld [vmem:[#allocation2 + $0x1c] sm:$0xf] }
  0x49   :  { %v123_v0 = vmax.bf16 %v930_v40, %v107_v55  ;;  %v253_v3 = vadd.bf16 %v977_v18, %v237_v58  ;;  %v356_v5 = vadd.bf16 %v340_v59, %v275_v36  ;;  %v124_v7 = vmax.bf16 %v930_v40, %v108_v61  ;;  %v142_v58 = vld [vmem:[#allocation2 + $0x58] sm:$0xf]  ;;  %v143_v59 = vld [vmem:[#allocation2 + $0x5c] sm:$0xf] }
  0x4a   :  { %v357_v6 = vadd.bf16 %v341_v60, %v276_v48  ;;  %v254_v8 = vadd.bf16 %v977_v18, %v238_v62  ;;  %v188_v10 = vmax.bf16 %v930_v40, %v172_v1  ;;  %v189_v11 = vmax.bf16 %v930_v40, %v173_v2 }
  0x4b   :  { %v269_v12 = vmax.bf16 %v930_v40, %v253_v3  ;;  %v302_v13 = vmul.bf16 %v975_v17, %v286_v63  ;;  %v372_v16 = vadd.bf16 %v356_v5, %v210_v46  ;;  %v303_v21 = vmul.bf16 %v975_v17, %v287_v4  ;;  %v224_v5 = vld [vmem:[#allocation2 + $0x9c] sm:$0xf] }
  0x4c   :  { %v373_v19 = vadd.bf16 %v357_v6, %v211_v47  ;;  %v270_v20 = vmax.bf16 %v930_v40, %v254_v8  ;;  %v204_v24 = vadd.bf16 %v188_v10, %v123_v0  ;;  %v205_v25 = vadd.bf16 %v189_v11, %v124_v7  ;;  %v295_v47 = vld [vmem:[#allocation2 + $0xf4] sm:$0xf]  ;;  %v223_v0 = vld [vmem:[#allocation2 + $0x98] sm:$0xf] }
  0x4d   :  { %v318_v26 = vadd.bf16 %v977_v18, %v302_v13  ;;  %v88_v27 = vmul.bf16 %v975_v17, %v61_v9  ;;  %v319_v30 = vadd.bf16 %v977_v18, %v303_v21  ;;  %v89_v31 = vmul.bf16 %v975_v17, %v62_v14  ;;  %v289_v21 = vld [vmem:[#allocation2 + $0xdc] sm:$0xf] }
  0x4e   :  { %v692_v29 = vcombine.low %v372_v16, %v373_v19  ;;  %v164_v32 = vmul.bf16 %v975_v17, %v148_v15  ;;  %v165_v35 = vmul.bf16 %v975_v17, %v149_v22  ;;  %v245_v36 = vmul.bf16 %v975_v17, %v229_v23 }
  0x4f   :  { %v334_v33 = vmax.bf16 %v930_v40, %v318_v26  ;;  %v115_v34 = vadd.bf16 %v977_v18, %v88_v27  ;;  %v335_v37 = vmax.bf16 %v930_v40, %v319_v30  ;;  %v116_v38 = vadd.bf16 %v977_v18, %v89_v31  ;;  %v63_v30 = vld [vmem:[#allocation2 + $0x38] sm:$0xf]  ;;  %v64_v31 = vld [vmem:[#allocation2 + $0x3c] sm:$0xf] }
  0x50   :  { %823 = vmatmul.mubr.bf16.vlgmr.msra.gmra.mxu1 %v692_v29  ;;  %v180_v39 = vadd.bf16 %v977_v18, %v164_v32  ;;  %v246_v41 = vmul.bf16 %v975_v17, %v230_v28  ;;  %v181_v45 = vadd.bf16 %v977_v18, %v165_v35  ;;  %v261_v46 = vadd.bf16 %v977_v18, %v245_v36  ;;  %v150_v36 = vld [vmem:[#allocation2 + $0x78] sm:$0xf] }
  0x51   :  { %v350_v43 = vadd.bf16 %v334_v33, %v269_v12  ;;  %v131_v44 = vmax.bf16 %v930_v40, %v115_v34  ;;  %v351_v48 = vadd.bf16 %v335_v37, %v270_v20  ;;  %v132_v49 = vmax.bf16 %v930_v40, %v116_v38  ;;  %v288_v20 = vld [vmem:[#allocation2 + $0xd8] sm:$0xf]  ;;  %v151_v37 = vld [vmem:[#allocation2 + $0x7c] sm:$0xf] }
  0x52   :  { %v196_v50 = vmax.bf16 %v930_v40, %v180_v39  ;;  %v262_v51 = vadd.bf16 %v977_v18, %v246_v41  ;;  %v197_v55 = vmax.bf16 %v930_v40, %v181_v45  ;;  %v277_v56 = vmax.bf16 %v930_v40, %v261_v46  ;;  %v231_v38 = vld [vmem:[#allocation2 + $0xb8] sm:$0xf] }
  0x53   :  { %v366_v54 = vadd.bf16 %v350_v43, %v204_v24  ;;  %v310_v57 = vmul.bf16 %v975_v17, %v294_v42  ;;  %v367_v60 = vadd.bf16 %v351_v48, %v205_v25  ;;  %v311_v63 = vmul.bf16 %v975_v17, %v295_v47  ;;  %v232_v48 = vld [vmem:[#allocation2 + $0xbc] sm:$0xf] }
  0x54   :  { %v212_v61 = vadd.bf16 %v196_v50, %v131_v44  ;;  %v278_v62 = vmax.bf16 %v930_v40, %v262_v51  ;;  %v213_v1 = vadd.bf16 %v197_v55, %v132_v49  ;;  %v82_v3 = vmul.bf16 %v975_v17, %v55_v52 }
  0x55   :  { %v326_v2 = vadd.bf16 %v977_v18, %v310_v57  ;;  %v83_v4 = vmul.bf16 %v975_v17, %v56_v53  ;;  %v689_v6 = vcombine.low %v366_v54, %v367_v60  ;;  %v327_v7 = vadd.bf16 %v977_v18, %v311_v63 }
  0x56   :  { %v158_v8 = vmul.bf16 %v975_v17, %v142_v58  ;;  %v159_v9 = vmul.bf16 %v975_v17, %v143_v59  ;;  %v109_v11 = vadd.bf16 %v977_v18, %v82_v3  ;;  %v239_v13 = vmul.bf16 %v975_v17, %v223_v0 }
  0x57   :  { %v342_v10 = vmax.bf16 %v930_v40, %v326_v2  ;;  %v110_v12 = vadd.bf16 %v977_v18, %v83_v4  ;;  %818 = vmatprep.mubr.bf16.mxu0 %v689_v6  ;;  %v343_v14 = vmax.bf16 %v930_v40, %v327_v7  ;;  %v240_v19 = vmul.bf16 %v975_v17, %v224_v5 }
  0x58   :  { %v174_v15 = vadd.bf16 %v977_v18, %v158_v8  ;;  %v175_v16 = vadd.bf16 %v977_v18, %v159_v9  ;;  %v125_v23 = vmax.bf16 %v930_v40, %v109_v11  ;;  %v255_v25 = vadd.bf16 %v977_v18, %v239_v13 }
  0x59   :  { %v358_v22 = vadd.bf16 %v342_v10, %v277_v56  ;;  %v126_v24 = vmax.bf16 %v930_v40, %v110_v12  ;;  %v359_v26 = vadd.bf16 %v343_v14, %v278_v62  ;;  %v256_v29 = vadd.bf16 %v977_v18, %v240_v19  ;;  %v297_v62 = vld [vmem:[#allocation2 + $0xfc] sm:$0xf] }
  0x5a   :  { %v190_v27 = vmax.bf16 %v930_v40, %v174_v15  ;;  %v191_v28 = vmax.bf16 %v930_v40, %v175_v16  ;;  %v271_v33 = vmax.bf16 %v930_v40, %v255_v25  ;;  %v304_v34 = vmul.bf16 %v975_v17, %v288_v20 }
  0x5b   :  { %v374_v32 = vadd.bf16 %v358_v22, %v212_v61  ;;  %v305_v35 = vmul.bf16 %v975_v17, %v289_v21  ;;  %v375_v39 = vadd.bf16 %v359_v26, %v213_v1  ;;  %v272_v43 = vmax.bf16 %v930_v40, %v256_v29  ;;  %v296_v61 = vld [vmem:[#allocation2 + $0xf8] sm:$0xf] }
  0x5c   :  { %v206_v41 = vadd.bf16 %v190_v27, %v125_v23  ;;  %v207_v42 = vadd.bf16 %v191_v28, %v126_v24  ;;  %v320_v44 = vadd.bf16 %v977_v18, %v304_v34  ;;  %v90_v46 = vmul.bf16 %v975_v17, %v63_v30 }
  0x5d   :  { %v321_v45 = vadd.bf16 %v977_v18, %v305_v35  ;;  %v91_v47 = vmul.bf16 %v975_v17, %v64_v31  ;;  %v693_v49 = vcombine.low %v374_v32, %v375_v39  ;;  %v166_v50 = vmul.bf16 %v975_v17, %v150_v36 }
  0x5e   :  { %v167_v51 = vmul.bf16 %v975_v17, %v151_v37  ;;  %v247_v52 = vmul.bf16 %v975_v17, %v231_v38  ;;  %v336_v53 = vmax.bf16 %v930_v40, %v320_v44  ;;  %v117_v55 = vadd.bf16 %v977_v18, %v90_v46 }
  0x5f   :  { %v337_v54 = vmax.bf16 %v930_v40, %v321_v45  ;;  %v118_v56 = vadd.bf16 %v977_v18, %v91_v47  ;;  %826 = vmatprep.mubr.bf16.mxu1 %v693_v49  ;;  %v182_v57 = vadd.bf16 %v977_v18, %v166_v50  ;;  %v248_v59 = vmul.bf16 %v975_v17, %v232_v48 }
  0x60   :  { %v183_v58 = vadd.bf16 %v977_v18, %v167_v51  ;;  %v263_v60 = vadd.bf16 %v977_v18, %v247_v52  ;;  %v352_v63 = vadd.bf16 %v336_v53, %v271_v33  ;;  %v133_v1 = vmax.bf16 %v930_v40, %v117_v55 }
  0x61   :  { %v353_v0 = vadd.bf16 %v337_v54, %v272_v43  ;;  %v134_v2 = vmax.bf16 %v930_v40, %v118_v56  ;;  %v198_v3 = vmax.bf16 %v930_v40, %v182_v57  ;;  %v264_v5 = vadd.bf16 %v977_v18, %v248_v59 }
  0x62   :  { %v199_v4 = vmax.bf16 %v930_v40, %v183_v58  ;;  %v368_v6 = vadd.bf16 %v352_v63, %v206_v41  ;;  %v312_v8 = vmul.bf16 %v975_v17, %v296_v61  ;;  %v313_v9 = vmul.bf16 %v975_v17, %v297_v62 }
  0x63   :  { %v369_v7 = vadd.bf16 %v353_v0, %v207_v42  ;;  %v279_v10 = vmax.bf16 %v930_v40, %v263_v60  ;;  %v280_v12 = vmax.bf16 %v930_v40, %v264_v5  ;;  %v214_v15 = vadd.bf16 %v198_v3, %v133_v1 }
  0x64   :  { %v328_v13 = vadd.bf16 %v977_v18, %v312_v8  ;;  %v329_v14 = vadd.bf16 %v977_v18, %v313_v9  ;;  %v215_v16 = vadd.bf16 %v199_v4, %v134_v2 }
  0x65   :  { %v690_v11 = vcombine.low %v368_v6, %v369_v7 }
  0x66   :  { %v344_v19 = vmax.bf16 %v930_v40, %v328_v13  ;;  %v345_v20 = vmax.bf16 %v930_v40, %v329_v14 }
  0x67   :  { %819 = vmatmul.mubr.bf16.gmra.mxu0 %v690_v11 }
  0x68   :  { %v360_v21 = vadd.bf16 %v344_v19, %v279_v10  ;;  %v361_v22 = vadd.bf16 %v345_v20, %v280_v12 }
  0x6a   :  { %v376_v23 = vadd.bf16 %v360_v21, %v214_v15  ;;  %v377_v17 = vadd.bf16 %v361_v22, %v215_v16 }
  0x6c   :  { %v694_v24 = vcombine.low %v376_v23, %v377_v17 }
  0x6e   :  { %827 = vmatmul.mubr.bf16.gmra.mxu1 %v694_v24 }
 0x108   :  { %v816_v25 = vpop.f32.mrf.mxu0 }
 0x10a   :  { %v524_v26 = vpop.f32.mrf.mxu0 }
 0x10c   :  { %v817_v27 = vpop.f32.mrf.mxu0 }
 0x10d   :  { %v743_v28 = vpack.c.bf16 %v817_v27, %v816_v25 }
 0x10e   :  { %v527_v29 = vpop.f32.mrf.mxu0 }
 0x10f   :  { %775 = vst [vmem:[#allocation7 + $0x8] sm:$0xff] %v743_v28   ;;  %v738_v18 = vpack.c.bf16 %v527_v29, %v524_v26 }
 0x110   :  { %v824_v30 = vpop.f32.mrf.mxu1 }
 0x111   :  { %739 = vst [vmem:[#allocation7] sm:$0xff] %v738_v18  }
 0x112   :  { %v556_v31 = vpop.f32.mrf.mxu1 }
 0x114   :  { %v825_v32 = vpop.f32.mrf.mxu1 }
 0x115   :  { %v763_v33 = vpack.c.bf16 %v825_v32, %v824_v30 }
 0x116   :  { %v559_v34 = vpop.f32.mrf.mxu1 }
 0x117   :  { %779 = vst [vmem:[#allocation7 + $0x28] sm:$0xff] %v763_v33   ;;  %v758_v40 = vpack.c.bf16 %v559_v34, %v556_v31 }
 0x119   :  { %778 = vst [vmem:[#allocation7 + $0x20] sm:$0xff] %v758_v40  }
 0x127   :  { %v820_v35 = vpop.f32.mrf.mxu0 }
 0x129   :  { %v540_v36 = vpop.f32.mrf.mxu0 }
 0x12b   :  { %v821_v37 = vpop.f32.mrf.mxu0 }
 0x12c   :  { %v753_v38 = vpack.c.bf16 %v821_v37, %v820_v35 }
 0x12d   :  { %v543_v39 = vpop.f32.mrf.mxu0 }
 0x12e   :  { %777 = vst [vmem:[#allocation7 + $0x18] sm:$0xff] %v753_v38   ;;  %v748_v41 = vpack.c.bf16 %v543_v39, %v540_v36  ;;  %v828_v42 = vpop.f32.mrf.mxu1 }
 0x130   :  { %776 = vst [vmem:[#allocation7 + $0x10] sm:$0xff] %v748_v41   ;;  %v572_v43 = vpop.f32.mrf.mxu1 }
 0x132   :  { %v829_v44 = vpop.f32.mrf.mxu1 }
 0x133   :  { %v773_v45 = vpack.c.bf16 %v829_v44, %v828_v42 }
 0x134   :  { %v575_v46 = vpop.f32.mrf.mxu1 }
 0x135   :  { %781 = vst [vmem:[#allocation7 + $0x38] sm:$0xff] %v773_v45   ;;  %v768_v47 = vpack.c.bf16 %v575_v46, %v572_v43 }
 0x137   :  { %780 = vst [vmem:[#allocation7 + $0x30] sm:$0xff] %v768_v47  }
 0x138   :  { %911 = shalt.err (!%p908_p0)
}
 0x139   :  { %678 = dma.vmem_to_hbm [thread:$0]  %s673_s2, 1024, %s1193_s4, [#allocation4], %s927_s18, %s927_s18, %s928_s19  }
 0x13a   :  { %924 = dma.done.wait [#allocation4], 1024  }
 0x13b   :  { %925 = vsyncadd [#allocation4], 4294966272 }
 0x13c   :  { %682 = vsyncpa [#allocation3], 1 }
 0x13d   :  { %683 = vsyncpa [#allocation6], 1 }
 0x13e   :  { %684 = vsyncpa [#allocation4], 1 }

</bundles_post_ra>
